<compile_context>
chip_gen: v7x
topology: tpu7x:2x2x1
jax: 0.10.0
libtpu: 0.0.40
codegen_flags: <defaults>
</compile_context>

<pallas_src>
import functools
import math

import jax
import jax.numpy as jnp
from jax.experimental import pallas as pl
from jax.experimental.pallas import tpu as pltpu


def _round_up(x, m):
    return (x + m - 1) // m * m


def _combine_kernel(user_ref, item_ref, aux_ref,
                    w3_ref, bu_ref, wc_ref, bc_ref,
                    out_ref, *, F):
    user = user_ref[...]
    item = item_ref[...]
    aux = aux_ref[...]

    # Fused matmul: u + i + a == cat(user, item, aux) @ [Wu^T; Wi^T; Wa^T]
    # One MXU pass with K = 3F instead of three K = F passes.
    x3 = jnp.concatenate([user, item, aux], axis=1)                 # (TB, 3F)
    uia = jnp.dot(x3, w3_ref[...], preferred_element_type=jnp.float32) + bu_ref[...]

    # TODO(synk): dropout omitted (eval-mode identity); training-mode dropout
    # would need a mask from pltpu.prng_seed + pltpu.prng_random_bits here.
    gt = jnp.tanh(uia)
    t_aux = gt * aux

    # Fused: cat(user, t_aux) @ Wcomb^T in one MXU pass (K = 2F).
    xc = jnp.concatenate([user, t_aux], axis=1)                     # (TB, 2F)
    t_comb = jnp.dot(xc, wc_ref[...], preferred_element_type=jnp.float32) + bc_ref[...]
    t_comb = jnp.maximum(t_comb, 0.0)

    # z_ui = cat(t_comb, item): two direct slab stores, no concat temporary.
    out_ref[:, :F] = t_comb.astype(out_ref.dtype)
    out_ref[:, F:] = item.astype(out_ref.dtype)


def prepare_combine_params(params):
    """One-time weight packing/transposition. Call OUTSIDE the per-step forward."""
    F = params["w_u_w"].shape[0]
    w3 = jnp.concatenate(
        [params["w_u_w"].T, params["w_i_w"].T, params["w_aux_w"].T], axis=0)  # (3F, F)
    return {
        "w3": w3,                                   # (3F, F)
        "bu": params["w_u_b"].reshape(1, F),        # (1, F)
        "wc": params["w_comb_w"].T,                 # (2F, F)
        "bc": params["w_comb_b"].reshape(1, F),     # (1, F)
    }


def combine_layer_forward(user_latent, item_latent, aux_latent, packed,
                          *, block_rows=512):
    """user/item/aux_latent: (B, F) float32. Returns (B, 2F) float32.

    TODO(synk): for HBM-bandwidth-bound production sizes, casting activations
    and weights to bfloat16 (keeping f32 MXU accumulation) halves bytes moved;
    kept f32 here for bit-tight parity with the f32 PyTorch reference.
    """
    B, F = user_latent.shape

    # Row tile: multiple of 8 sublanes; pad batch so every tile is full (no OOB).
    B8 = _round_up(B, 8)
    TB = min(_round_up(block_rows, 8), B8)
    B_pad = _round_up(B8, TB)
    if B_pad != B:
        pad = [(0, B_pad - B), (0, 0)]
        user_latent = jnp.pad(user_latent, pad)
        item_latent = jnp.pad(item_latent, pad)
        aux_latent = jnp.pad(aux_latent, pad)

    grid = (B_pad // TB,)

    act_spec = pl.BlockSpec((TB, F), lambda i: (i, 0))
    out_spec = pl.BlockSpec((TB, 2 * F), lambda i: (i, 0))
    # Full-array weight/bias blocks with constant index maps -> fetched once,
    # resident in VMEM across all grid iterations.
    w3_spec = pl.BlockSpec((3 * F, F), lambda i: (0, 0))
    bu_spec = pl.BlockSpec((1, F), lambda i: (0, 0))
    wc_spec = pl.BlockSpec((2 * F, F), lambda i: (0, 0))
    bc_spec = pl.BlockSpec((1, F), lambda i: (0, 0))

    itemsize = 4  # f32
    # Double-buffered activation/output streams + resident weights, with headroom.
    vmem_need = (2 * TB * (3 * F + 2 * F) * itemsize
                 + (5 * F * F + 2 * F) * itemsize)
    # Explicit scoped-VMEM limit, kept safely under v7x's 64 MiB per-TC VMEM.
    vmem_limit = int(min(max(4 * vmem_need, 32 * 1024 * 1024), 60 * 1024 * 1024))

    cost = pl.CostEstimate(
        flops=2 * B_pad * F * (3 * F) + 2 * B_pad * F * (2 * F),
        transcendentals=B_pad * F,
        bytes_accessed=(B_pad * (3 * F + 2 * F) + 5 * F * F + 2 * F) * itemsize,
    )

    out = pl.pallas_call(
        functools.partial(_combine_kernel, F=F),
        out_shape=jax.ShapeDtypeStruct((B_pad, 2 * F), jnp.float32),
        grid=grid,
        in_specs=[act_spec, act_spec, act_spec,
                  w3_spec, bu_spec, wc_spec, bc_spec],
        out_specs=out_spec,
        compiler_params=pltpu.CompilerParams(
            dimension_semantics=("parallel",),
            vmem_limit_bytes=vmem_limit,
        ),
        cost_estimate=cost,
    )(user_latent, item_latent, aux_latent,
      packed["w3"], packed["bu"], packed["wc"], packed["bc"])

    return out[:B] if B_pad != B else out


def _init_params(key, latent_factors):
    """Deterministic init mirroring torch.nn.Linear defaults (U[-1/sqrt(fan_in), ...])."""
    F = latent_factors
    ks = jax.random.split(key, 6)

    def lin_w(k, out_f, in_f):
        bound = 1.0 / math.sqrt(in_f)
        return jax.random.uniform(k, (out_f, in_f), jnp.float32, -bound, bound)

    def lin_b(k, out_f, in_f):
        bound = 1.0 / math.sqrt(in_f)
        return jax.random.uniform(k, (out_f,), jnp.float32, -bound, bound)

    return {
        "w_u_w": lin_w(ks[0], F, F),
        "w_u_b": lin_b(ks[1], F, F),
        "w_i_w": lin_w(ks[2], F, F),
        "w_aux_w": lin_w(ks[3], F, F),
        "w_comb_w": lin_w(ks[4], F, 2 * F),
        "w_comb_b": lin_b(ks[5], F, 2 * F),
    }


def _reference_forward(user, item, aux, p):
    """Pure-JAX reference matching the PyTorch module (eval mode)."""
    u = user @ p["w_u_w"].T + p["w_u_b"]
    i = item @ p["w_i_w"].T
    a = aux @ p["w_aux_w"].T
    gt = jnp.tanh(u + i + a)
    t_aux = gt * aux
    t_comb = jnp.concatenate([user, t_aux], axis=1) @ p["w_comb_w"].T + p["w_comb_b"]
    t_comb = jnp.maximum(t_comb, 0.0)
    return jnp.concatenate([t_comb, item], axis=1)


def _check(B, F, key, params, packed, **fwd_kwargs):
    k_u, k_i, k_a = jax.random.split(key, 3)
    user = jax.random.normal(k_u, (B, F), jnp.float32)
    item = jax.random.normal(k_i, (B, F), jnp.float32)
    aux = jax.random.normal(k_a, (B, F), jnp.float32)

    z_ui = combine_layer_forward(user, item, aux, packed, **fwd_kwargs)
    z_ui = jax.block_until_ready(z_ui)

    ref = _reference_forward(user, item, aux, params)
    assert z_ui.shape == (B, 2 * F), z_ui.shape
    assert jnp.allclose(z_ui, ref, atol=2e-5, rtol=2e-5), (
        f"mismatch vs reference at B={B}")


if __name__ == "__main__":
    F = 32                 # latent_factors
    key = jax.random.PRNGKey(0)
    k_p, k1, k2, k3 = jax.random.split(key, 4)

    params = _init_params(k_p, F)
    packed = prepare_combine_params(params)   # one-time packing, outside forward

    # Small canonical case.
    _check(8, F, k1, params, packed)
    # Batch not a multiple of 8 -> exercises the padding path.
    _check(13, F, k2, params, packed)
    # Multi-tile grid (3 iterations) -> exercises pipelining / resident weights.
    _check(24, F, k3, params, packed, block_rows=8)

    print("KERNEL_OK")
</pallas_src>

<mosaic_0001>
module attributes {stable_mosaic.version = 11 : i64} {
  func.func @_combine_kernel(%arg0: i32, %arg1: memref<8x32xf32, #tpu.memory_space<vmem>>, %arg2: memref<8x32xf32, #tpu.memory_space<vmem>>, %arg3: memref<8x32xf32, #tpu.memory_space<vmem>>, %arg4: memref<96x32xf32, #tpu.memory_space<vmem>>, %arg5: memref<1x32xf32, #tpu.memory_space<vmem>>, %arg6: memref<64x32xf32, #tpu.memory_space<vmem>>, %arg7: memref<1x32xf32, #tpu.memory_space<vmem>>, %arg8: memref<8x64xf32, #tpu.memory_space<vmem>>) attributes {dimension_semantics = [#tpu.dimension_semantics<parallel>], iteration_bounds = array<i64: 1>, scalar_prefetch = 0 : i64, scratch_operands = 0 : i64, tpu.core_type = #tpu.core_type<tc>, window_params = [{transform_indices = @transform_0, window_bounds = array<i64: 8, 32>}, {transform_indices = @transform_1, window_bounds = array<i64: 8, 32>}, {transform_indices = @transform_2, window_bounds = array<i64: 8, 32>}, {pipeline_mode = #tpu.pipeline_mode<synchronous>, transform_indices = @transform_3, window_bounds = array<i64: 96, 32>}, {pipeline_mode = #tpu.pipeline_mode<synchronous>, transform_indices = @transform_4, window_bounds = array<i64: 1, 32>}, {pipeline_mode = #tpu.pipeline_mode<synchronous>, transform_indices = @transform_5, window_bounds = array<i64: 64, 32>}, {pipeline_mode = #tpu.pipeline_mode<synchronous>, transform_indices = @transform_6, window_bounds = array<i64: 1, 32>}, {transform_indices = @transform_7, window_bounds = array<i64: 8, 64>}]} {
    %c0 = arith.constant 0 : index
    %c0_0 = arith.constant 0 : index
    %0 = vector.load %arg1[%c0, %c0_0] : memref<8x32xf32, #tpu.memory_space<vmem>>, vector<8x32xf32>
    %c0_1 = arith.constant 0 : index
    %c0_2 = arith.constant 0 : index
    %1 = vector.load %arg2[%c0_1, %c0_2] : memref<8x32xf32, #tpu.memory_space<vmem>>, vector<8x32xf32>
    %c0_3 = arith.constant 0 : index
    %c0_4 = arith.constant 0 : index
    %2 = vector.load %arg3[%c0_3, %c0_4] : memref<8x32xf32, #tpu.memory_space<vmem>>, vector<8x32xf32>
    %3 = tpu.concatenate %0, %1, %2 in 1 : vector<8x32xf32>, vector<8x32xf32>, vector<8x32xf32> -> vector<8x96xf32>
    %c0_5 = arith.constant 0 : index
    %c0_6 = arith.constant 0 : index
    %4 = vector.load %arg4[%c0_5, %c0_6] : memref<96x32xf32, #tpu.memory_space<vmem>>, vector<96x32xf32>
    %cst = arith.constant dense<0.000000e+00> : vector<8x32xf32>
    %5 = tpu.matmul %3, %4, %cst {dimension_numbers = #tpu.dot_dimension_numbers<[1], [0], [0], [1], [0, 0, 1, 1], [], []>} : vector<8x96xf32>, vector<96x32xf32>, vector<8x32xf32> -> vector<8x32xf32>
    %c0_7 = arith.constant 0 : index
    %c0_8 = arith.constant 0 : index
    %6 = vector.load %arg5[%c0_7, %c0_8] : memref<1x32xf32, #tpu.memory_space<vmem>>, vector<1x32xf32>
    %7 = vector.broadcast %6 : vector<1x32xf32> to vector<8x32xf32>
    %8 = arith.addf %5, %7 : vector<8x32xf32>
    %9 = math.tanh %8 : vector<8x32xf32>
    %10 = arith.mulf %9, %2 : vector<8x32xf32>
    %11 = tpu.concatenate %0, %10 in 1 : vector<8x32xf32>, vector<8x32xf32> -> vector<8x64xf32>
    %c0_9 = arith.constant 0 : index
    %c0_10 = arith.constant 0 : index
    %12 = vector.load %arg6[%c0_9, %c0_10] : memref<64x32xf32, #tpu.memory_space<vmem>>, vector<64x32xf32>
    %cst_11 = arith.constant dense<0.000000e+00> : vector<8x32xf32>
    %13 = tpu.matmul %11, %12, %cst_11 {dimension_numbers = #tpu.dot_dimension_numbers<[1], [0], [0], [1], [0, 0, 1, 1], [], []>} : vector<8x64xf32>, vector<64x32xf32>, vector<8x32xf32> -> vector<8x32xf32>
    %c0_12 = arith.constant 0 : index
    %c0_13 = arith.constant 0 : index
    %14 = vector.load %arg7[%c0_12, %c0_13] : memref<1x32xf32, #tpu.memory_space<vmem>>, vector<1x32xf32>
    %15 = vector.broadcast %14 : vector<1x32xf32> to vector<8x32xf32>
    %16 = arith.addf %13, %15 : vector<8x32xf32>
    %cst_14 = arith.constant 0.000000e+00 : f32
    %17 = vector.broadcast %cst_14 : f32 to vector<8x32xf32>
    %18 = arith.maximumf %16, %17 : vector<8x32xf32>
    %c0_15 = arith.constant 0 : index
    %c0_16 = arith.constant 0 : index
    %19 = vector.load %arg8[%c0_15, %c0_16] : memref<8x64xf32, #tpu.memory_space<vmem>>, vector<8x32xf32>
    tpu.vector_store %arg8[%c0_15, %c0_16], %18 {strides = array<i32>} : memref<8x64xf32, #tpu.memory_space<vmem>>, vector<8x32xf32>,
    %c0_17 = arith.constant 0 : index
    %c32 = arith.constant 32 : index
    %20 = vector.load %arg8[%c0_17, %c32] : memref<8x64xf32, #tpu.memory_space<vmem>>, vector<8x32xf32>
    tpu.vector_store %arg8[%c0_17, %c32], %1 {strides = array<i32>} : memref<8x64xf32, #tpu.memory_space<vmem>>, vector<8x32xf32>,
    return
  }
  func.func @transform_0(%arg0: i32) -> (i32, i32) {
    %c0_i32 = arith.constant 0 : i32
    %c0_i32_0 = arith.constant 0 : i32
    return %arg0, %c0_i32 : i32, i32
  }
  func.func @transform_1(%arg0: i32) -> (i32, i32) {
    %c0_i32 = arith.constant 0 : i32
    %c0_i32_0 = arith.constant 0 : i32
    return %arg0, %c0_i32 : i32, i32
  }
  func.func @transform_2(%arg0: i32) -> (i32, i32) {
    %c0_i32 = arith.constant 0 : i32
    %c0_i32_0 = arith.constant 0 : i32
    return %arg0, %c0_i32 : i32, i32
  }
  func.func @transform_3(%arg0: i32) -> (i32, i32) {
    %c0_i32 = arith.constant 0 : i32
    %c0_i32_0 = arith.constant 0 : i32
    %c0_i32_1 = arith.constant 0 : i32
    return %c0_i32, %c0_i32_0 : i32, i32
  }
  func.func @transform_4(%arg0: i32) -> (i32, i32) {
    %c0_i32 = arith.constant 0 : i32
    %c0_i32_0 = arith.constant 0 : i32
    %c0_i32_1 = arith.constant 0 : i32
    return %c0_i32, %c0_i32_0 : i32, i32
  }
  func.func @transform_5(%arg0: i32) -> (i32, i32) {
    %c0_i32 = arith.constant 0 : i32
    %c0_i32_0 = arith.constant 0 : i32
    %c0_i32_1 = arith.constant 0 : i32
    return %c0_i32, %c0_i32_0 : i32, i32
  }
  func.func @transform_6(%arg0: i32) -> (i32, i32) {
    %c0_i32 = arith.constant 0 : i32
    %c0_i32_0 = arith.constant 0 : i32
    %c0_i32_1 = arith.constant 0 : i32
    return %c0_i32, %c0_i32_0 : i32, i32
  }
  func.func @transform_7(%arg0: i32) -> (i32, i32) {
    %c0_i32 = arith.constant 0 : i32
    %c0_i32_0 = arith.constant 0 : i32
    return %arg0, %c0_i32 : i32, i32
  }
}

</mosaic_0001>

<bundles_post_ra>
// kernel: tpu_custom_call.1
= control target key start
LH: loop header
LB: loop body
LE: loop exit
PB: predicated region body
PF: predicated region fallthrough
CT: control target
= control target key end

     0   :  { %s382_s28 = smov 32   ;;  %v383_v2 = vmov 0.0|0.0   ;;  %vm384_vm0 = vmmov 0   ;;  %v385_v8 = vmov 0.0   ;;  %s386_s13 = smov 64   ;;  %s536_s0 = inlined_call_operand.vmem [shape: f32[8,32], index: 0, kind: input, shape index: {}]   ;;  %s537_s1 = inlined_call_operand.vmem [shape: f32[8,32], index: 1, kind: input, shape index: {}]   ;;  %s538_s2 = inlined_call_operand.vmem [shape: f32[8,32], index: 2, kind: input, shape index: {}]   ;;  %s539_s3 = inlined_call_operand.vmem [shape: f32[96,32], index: 3, kind: input, shape index: {}]   ;;  %s540_s4 = inlined_call_operand.vmem [shape: f32[1,32], index: 4, kind: input, shape index: {}]   ;;  %s541_s5 = inlined_call_operand.vmem [shape: f32[64,32], index: 5, kind: input, shape index: {}]   ;;  %s542_s6 = inlined_call_operand.vmem [shape: f32[1,32], index: 6, kind: input, shape index: {}]   ;;  %s543_s7 = inlined_call_operand.hbm [shape: f32[8,64], index: 7, kind: output, shape index: {}]  }
   0x1   :  { %v28_v0 = vld [vmem:[%s537_s1] sm:$0xff]  ;;  %320 = vmatprep.subr.bf16.mxu0 %v383_v2  ;;  %v43_v3 = vld [vmem:[%s539_s3 + $0x8] sm:$0xff]  ;;  %v44_v4 = vld [vmem:[%s539_s3 + $0x10] sm:$0xff]  ;;  %338 = vmatprep.subr.bf16.mxu1 %v383_v2 }
   0x2   :  { %v42_v1 = vld [vmem:[%s539_s3] sm:$0xff]  ;;  %31 = vrot.lane.b32.xlu0 %v28_v0, %s382_s28  ;;  %v45_v5 = vld [vmem:[%s539_s3 + $0x18] sm:$0xff]  ;;  %298 = vmatprep.mubr.msk.f32.mxu0 %vm384_vm0, %v385_v8  ;;  %v47_v11 = vld [vmem:[%s539_s3 + $0x28] sm:$0xff] }
   0x3   :  { %v448_v6 = vld [vmem:[%s538_s2] sm:$0xff]  ;;  %v321_v7 = vpack.c.bf16 %v43_v3, %v42_v1  ;;  %317 = vmatprep.mubr.msk.f32.mxu1 %vm384_vm0, %v385_v8  ;;  %v324_v9 = vpack.c.bf16 %v45_v5, %v44_v4 }
   0x4   :  { %v46_v10 = vld [vmem:[%s539_s3 + $0x20] sm:$0xff] }
   0x5   :  { %322 = vmatpush3.bf16.msra.mxu0 %v321_v7 }
   0x6   :  { %35 = vrot.lane.b32.xlu0 %v448_v6, %s386_s13  ;;  %323 = vmatprep.subr.bf16.mxu0 %v383_v2 }
   0x7   :  { %12 = vsyncpa [#allocation3], 0  ;;  %v327_v12 = vpack.c.bf16 %v47_v11, %v46_v10  ;;  %v48_v13 = vld [vmem:[%s539_s3 + $0x30] sm:$0xff]  ;;  %v49_v14 = vld [vmem:[%s539_s3 + $0x38] sm:$0xff]  ;;  %vm38_vm1 = vcmask 261120   ;;  %vm40_vm2 = vcmask 523264  }
   0x8   :  { %v330_v15 = vpack.c.bf16 %v49_v14, %v48_v13  ;;  %v50_v16 = vld [vmem:[%s539_s3 + $0x40] sm:$0xff]  ;;  %v51_v17 = vld [vmem:[%s539_s3 + $0x48] sm:$0xff]  ;;  %v52_v19 = vld [vmem:[%s539_s3 + $0x50] sm:$0xff]  ;;  %vm61_vm3 = vcmask 785408   ;;  %vm232_vm4 = vcmask 523520  }
   0x9   :  { %325 = vmatpush3.bf16.msra.mxu0 %v324_v9  ;;  %v333_v18 = vpack.c.bf16 %v51_v17, %v50_v16  ;;  %v53_v20 = vld [vmem:[%s539_s3 + $0x58] sm:$0xff]  ;;  %v27_v23 = vld [vmem:[%s536_s0] sm:$0xff]  ;;  %v143_v28 = vld [vmem:[%s541_s5 + $0x8] sm:$0xff] }
   0xa   :  { %326 = vmatprep.subr.bf16.mxu0 %v383_v2  ;;  %v336_v21 = vpack.c.bf16 %v53_v20, %v52_v19  ;;  %v142_v27 = vld [vmem:[%s541_s5] sm:$0xff]  ;;  %v144_v29 = vld [vmem:[%s541_s5 + $0x10] sm:$0xff]  ;;  %v145_v31 = vld [vmem:[%s541_s5 + $0x18] sm:$0xff] }
   0xb   :  { %v339_v30 = vpack.c.bf16 %v143_v28, %v142_v27  ;;  %v342_v32 = vpack.c.bf16 %v145_v31, %v144_v29  ;;  %v146_v33 = vld [vmem:[%s541_s5 + $0x20] sm:$0xff]  ;;  %v147_v34 = vld [vmem:[%s541_s5 + $0x28] sm:$0xff]  ;;  %v148_v36 = vld [vmem:[%s541_s5 + $0x30] sm:$0xff] }
   0xc   :  { %v345_v35 = vpack.c.bf16 %v147_v34, %v146_v33  ;;  %v149_v37 = vld [vmem:[%s541_s5 + $0x38] sm:$0xff]  ;;  %v248_v39 = vld [vmem:[%s540_s4] ss:$0 sm:$0xff]  ;;  %s387_s4 = smov [#allocation2]  }
   0xd   :  { %328 = vmatpush3.bf16.msra.mxu0 %v327_v12  ;;  %340 = vmatpush3.bf16.msra.mxu1 %v339_v30  ;;  %v348_v38 = vpack.c.bf16 %v149_v37, %v148_v36  ;;  %v250_v47 = vld [vmem:[%s542_s6] ss:$0 sm:$0xff]  ;;  %s240_s24 = sshll.u32 %s387_s4, 4  ;;  %s241_s24 = int_to_ptr.vmem [resolvable:$true] %s240_s24 }
   0xe   :  { %329 = vmatprep.subr.bf16.mxu0 %v383_v2  ;;  %341 = vmatprep.subr.bf16.mxu1 %v383_v2  ;;  %p363_p1 = scmp.lt.s32.totalorder %s241_s24, %s241_s24 }
  0x11   :  { %331 = vmatpush3.bf16.msra.mxu0 %v330_v15  ;;  %343 = vmatpush3.bf16.msra.mxu1 %v342_v32 }
  0x12   :  { %332 = vmatprep.subr.bf16.mxu0 %v383_v2  ;;  %344 = vmatprep.subr.bf16.mxu1 %v383_v2 }
  0x15   :  { %334 = vmatpush3.bf16.msra.mxu0 %v333_v18  ;;  %346 = vmatpush3.bf16.msra.mxu1 %v345_v35 }
  0x16   :  { %335 = vmatprep.subr.bf16.mxu0 %v383_v2  ;;  %347 = vmatprep.subr.bf16.mxu1 %v383_v2 }
  0x19   :  { %337 = vmatpush3.bf16.msra.mxu0 %v336_v21  ;;  %349 = vmatpush3.bf16.msra.mxu1 %v348_v38 }
  0x74   :  { %v32_v22 = vpop.permute.xlu0 %31 }
  0x75   :  { %v39_v24 = vsel %vm38_vm1, %v27_v23, %v32_v22 }
  0x78   :  { %v36_v25 = vpop.permute.xlu0 %35 }
  0x79   :  { %v41_v26 = vsel %vm40_vm2, %v39_v24, %v36_v25 }
  0x7a   :  { %299 = vmatmul.mubr.msk.f32.vlgmr.msra.gmra.mrb[0].mxu0 %vm61_vm3, %v41_v26 }
 0x14d   :  { %v131_v40 = vpop.f32.mrb[0].mxu0 }
 0x14e   :  { %v132_v41 = vadd.f32 %v248_v39, %v131_v40  ;;  %v300_v42 = vpop.f32.mrb[1].mxu0 }
 0x150   :  { %356 = vtanh.f32 %v132_v41 }
 0x15a   :  { %v357_v43 = vpop.eup %356 }
 0x15b   :  { %v136_v44 = vmul.f32 %v357_v43, %v448_v6 }
 0x15d   :  { %138 = vrot.lane.b32.xlu1 %v136_v44, %s382_s28  ;;  %s358_s28 = scalar_lea.vmem %s241_s24, 128 }
 0x15e   :  { %p359_p0 = scmp.ne.s32.totalorder %s241_s24, %s358_s28  ;;  %p364_p2 = scmp.lt.s32.totalorder %s358_s28, %s358_s28 }
 0x160   :  { %p365_p3 = por %p364_p2, %p363_p1 }
 0x162   :  { %p366_p4 = pnand %p365_p3, %p359_p0 }
 0x1cf   :  { %v139_v45 = vpop.permute.xlu1 %138 }
 0x1d0   :  { %v141_v46 = vsel %vm38_vm1, %v27_v23, %v139_v45 }
 0x1d1   :  { %318 = vmatmul.mubr.msk.f32.vlgmr.msra.gmra.mrb[0].mxu1 %vm40_vm2, %v141_v46 }
 0x2a4   :  { %v226_v48 = vpop.f32.mrb[0].mxu1 }
 0x2a5   :  { %v227_v49 = vadd.f32 %v250_v47, %v226_v48  ;;  %v319_v50 = vpop.f32.mrb[1].mxu1 }
 0x2a7   :  { %v230_v51 = vmax.f32 %v227_v49, 0.0 }
 0x2a9   :  { %231 = vst.msk [vmem:[#allocation2] sm:$0xff] %vm38_vm1, %v230_v51 }
 0x2aa   :  { %233 = vst.msk [vmem:[#allocation2] sm:$0xff] %vm232_vm4, %v32_v22 }
 0x2ab   :  { %369 = shalt.err (!%p366_p4)
}
 0x2ac   :  { %s370_s26 = scalar_lea.hbm %s543_s7, 128 }
 0x2ad   :  { %p371_p5 = scmp.ne.s32.totalorder %s543_s7, %s370_s26  ;;  %p374_p6 = scmp.lt.u32.totalorder %s370_s26, %s543_s7 }
 0x2af   :  { %p376_p7 = pnand %p374_p6, %p371_p5 }
 0x2b1   :  { %379 = shalt.err (!%p376_p7)
}
 0x2b2   :  { %243 = dma.vmem_to_hbm [thread:$0]  %s241_s24, 128, %s543_s7, [#allocation3]  }
 0x2b3   :  { %380 = dma.done.wait [#allocation3], 128  }
 0x2b4   :  { %381 = vsyncadd [#allocation3], 4294967168 }
 0x2b5   :  { %247 = vsyncpa [#allocation3], 1 }

</bundles_post_ra>
